<compile_context>
chip_gen: v7x
topology: tpu7x:2x2x1
jax: 0.10.0
libtpu: 0.0.40
codegen_flags: <defaults>
</compile_context>

<pallas_src>
import functools

import jax
import jax.numpy as jnp
from jax.experimental import pallas as pl
from jax.experimental.pallas import tpu as pltpu

LN_EPS = 1e-5  # PyTorch nn.LayerNorm default


def _round_up(n, m):
    return ((n + m - 1) // m) * m


def _tpu_config():
    """(default_tile_b, vmem_limit_bytes, two_tensorcores) per TPU generation."""
    kind = ""
    try:
        kind = jax.devices()[0].device_kind.lower()
    except Exception:
        pass
    if "v7" in kind:
        # v7x: 64 MiB physical VMEM per TC, 2 TCs per chip.
        return 4096, 48 * 1024 * 1024, True
    # v5e / v6e (and fallback): 128 MiB physical VMEM, single TensorCore.
    return 8192, 96 * 1024 * 1024, False


def _layernorm(h, gamma, beta):
    # Fused single-pass statistics: var = E[h^2] - mean^2, affine folded into
    # one scale/shift so only one elementwise pass touches the full tile.
    mean = jnp.mean(h, axis=-1, keepdims=True)
    mean_sq = jnp.mean(h * h, axis=-1, keepdims=True)
    var = jnp.maximum(mean_sq - mean * mean, 0.0)
    inv = jax.lax.rsqrt(var + LN_EPS)
    scale = inv * gamma
    return h * scale + (beta - mean * scale)


def actor_kernel(
    x_ref,
    w1_ref, b1_ref, g1_ref, be1_ref,
    w2_ref, b2_ref, g2_ref, be2_ref,
    w3_ref, b3_ref,
    out_ref,
    *, max_action, action_dim,
):
    # Ingest f32 and cast to bf16 in-kernel (VPU cast is hidden under the DMA).
    x = x_ref[...].astype(jnp.bfloat16)

    # fc1 + ln1 + relu   (bf16 MXU inputs, f32 accumulate / VPU math)
    h = jnp.dot(x, w1_ref[...], preferred_element_type=jnp.float32) + b1_ref[...]
    h = _layernorm(h, g1_ref[...], be1_ref[...])
    h = jnp.maximum(h, 0.0)

    # fc2 + ln2 + relu
    h = jnp.dot(h.astype(jnp.bfloat16), w2_ref[...],
                preferred_element_type=jnp.float32) + b2_ref[...]
    h = _layernorm(h, g2_ref[...], be2_ref[...])
    h = jnp.maximum(h, 0.0)

    # fc3 (lane-padded to 128 in VMEM for a clean MXU tile) + tanh * max_action;
    # only the first action_dim columns are stored (narrow masked store).
    a = jnp.dot(h.astype(jnp.bfloat16), w3_ref[...],
                preferred_element_type=jnp.float32) + b3_ref[...]
    a = jnp.tanh(a) * max_action
    out_ref[...] = a[:, :action_dim].astype(out_ref.dtype)


def prepare_actor_params(params):
    """Cast matmul weights to bf16, reshape 1-D params to (1, D), pad fc3 to 128 lanes."""
    hidden_dim = params["w1"].shape[1]
    action_dim = params["w3"].shape[1]
    out_pad = _round_up(max(action_dim, 1), 128)

    w3p = jnp.zeros((hidden_dim, out_pad), jnp.float32).at[:, :action_dim].set(params["w3"])
    b3p = jnp.zeros((out_pad,), jnp.float32).at[:action_dim].set(params["b3"])

    return {
        "w1": params["w1"].astype(jnp.bfloat16),
        "w2": params["w2"].astype(jnp.bfloat16),
        "w3": w3p.astype(jnp.bfloat16),
        "b1": params["b1"].reshape(1, -1),
        "b2": params["b2"].reshape(1, -1),
        "b3": b3p.reshape(1, -1),
        "g1": params["g1"].reshape(1, -1),
        "g2": params["g2"].reshape(1, -1),
        "be1": params["be1"].reshape(1, -1),
        "be2": params["be2"].reshape(1, -1),
    }


@functools.partial(jax.jit,
                   static_argnames=("max_action", "action_dim", "tile_b", "vmem_limit"))
def _actor_forward_impl(x, pp, max_action, action_dim, tile_b, vmem_limit):
    B, state_dim = x.shape
    hidden_dim = pp["w1"].shape[1]
    out_pad = pp["w3"].shape[1]

    grid = (pl.cdiv(B, tile_b),)  # ragged last block handled by Pallas (no jnp.pad)

    kernel = functools.partial(actor_kernel,
                               max_action=float(max_action),
                               action_dim=int(action_dim))

    # Weights / params stay resident across grid steps (constant block index).
    resident = lambda a: pl.BlockSpec(a.shape, lambda i: (0, 0))

    in_specs = [
        pl.BlockSpec((tile_b, state_dim), lambda i: (i, 0)),
        resident(pp["w1"]), resident(pp["b1"]), resident(pp["g1"]), resident(pp["be1"]),
        resident(pp["w2"]), resident(pp["b2"]), resident(pp["g2"]), resident(pp["be2"]),
        resident(pp["w3"]), resident(pp["b3"]),
    ]

    flops = 2 * B * (state_dim * hidden_dim + hidden_dim * hidden_dim + hidden_dim * out_pad)
    bytes_accessed = (4 * B * (state_dim + action_dim)                      # x in, out
                      + 2 * hidden_dim * (state_dim + hidden_dim + out_pad)  # bf16 weights
                      + 4 * (6 * hidden_dim + out_pad))                      # biases / ln params
    cost = pl.CostEstimate(flops=int(flops),
                           transcendentals=int(B * out_pad),
                           bytes_accessed=int(bytes_accessed))

    return pl.pallas_call(
        kernel,
        out_shape=jax.ShapeDtypeStruct((B, action_dim), jnp.float32),
        grid=grid,
        in_specs=in_specs,
        # Last dim equals the full array dim -> legal narrow (unpadded) output block.
        out_specs=pl.BlockSpec((tile_b, action_dim), lambda i: (i, 0)),
        compiler_params=pltpu.CompilerParams(
            dimension_semantics=("parallel",),
            vmem_limit_bytes=int(vmem_limit),
        ),
        cost_estimate=cost,
    )(
        x,
        pp["w1"], pp["b1"], pp["g1"], pp["be1"],
        pp["w2"], pp["b2"], pp["g2"], pp["be2"],
        pp["w3"], pp["b3"],
    )


def actor_forward(x, prepped_params, max_action, action_dim, tile_b=None):
    """x: (B, state_dim) float32. prepped_params: output of prepare_actor_params."""
    B = x.shape[0]
    hidden_dim = prepped_params["w1"].shape[1]
    default_tile, vmem_bytes, two_cores = _tpu_config()

    tb = int(tile_b) if tile_b is not None else default_tile
    # Keep ~4 live f32 (tile_b, hidden) slabs within half the VMEM budget
    # (matters on v7x / large hidden; no-op for small models).
    cap_rows = max(512, (vmem_bytes // 2) // (16 * max(hidden_dim, 128)))
    tb = min(tb, _round_up(cap_rows, 8))
    if two_cores:
        # Guarantee >= 2 grid steps so the "parallel" axis shards across both v7x TCs.
        tb = min(tb, max(8, _round_up(pl.cdiv(B, 2), 8)))
    tb = min(tb, _round_up(max(B, 1), 8))
    tb = max(8, (tb // 8) * 8)  # multiple of 8 sublanes

    return _actor_forward_impl(x, prepped_params, float(max_action), int(action_dim),
                               tb, int(vmem_bytes))


def init_actor_params(key, state_dim, action_dim, hidden_dim):
    """Deterministic init mimicking PyTorch nn.Linear default (uniform +/- 1/sqrt(fan_in)).
    Weights are stored TRANSPOSED: (in_features, out_features)."""
    keys = jax.random.split(key, 6)

    def linear(kw, kb, fan_in, fan_out):
        bound = 1.0 / jnp.sqrt(jnp.float32(fan_in))
        w = jax.random.uniform(kw, (fan_in, fan_out), jnp.float32, -bound, bound)
        b = jax.random.uniform(kb, (fan_out,), jnp.float32, -bound, bound)
        return w, b

    w1, b1 = linear(keys[0], keys[1], state_dim, hidden_dim)
    w2, b2 = linear(keys[2], keys[3], hidden_dim, hidden_dim)
    w3, b3 = linear(keys[4], keys[5], hidden_dim, action_dim)

    return {
        "w1": w1, "b1": b1,
        "g1": jnp.ones((hidden_dim,), jnp.float32), "be1": jnp.zeros((hidden_dim,), jnp.float32),
        "w2": w2, "b2": b2,
        "g2": jnp.ones((hidden_dim,), jnp.float32), "be2": jnp.zeros((hidden_dim,), jnp.float32),
        "w3": w3, "b3": b3,
    }


def actor_forward_ref(x, params, max_action):
    """Pure-JAX reference matching the kernel's numerics (bf16 dot inputs, f32 math)."""
    w1 = params["w1"].astype(jnp.bfloat16)
    w2 = params["w2"].astype(jnp.bfloat16)
    w3 = params["w3"].astype(jnp.bfloat16)

    h = jnp.dot(x.astype(jnp.bfloat16), w1, preferred_element_type=jnp.float32) + params["b1"]
    h = _layernorm(h, params["g1"], params["be1"])
    h = jnp.maximum(h, 0.0)
    h = jnp.dot(h.astype(jnp.bfloat16), w2, preferred_element_type=jnp.float32) + params["b2"]
    h = _layernorm(h, params["g2"], params["be2"])
    h = jnp.maximum(h, 0.0)
    a = jnp.dot(h.astype(jnp.bfloat16), w3, preferred_element_type=jnp.float32) + params["b3"]
    return jnp.tanh(a) * max_action


if __name__ == "__main__":
    key = jax.random.PRNGKey(0)
    k_params, k_x = jax.random.split(key)

    batch = 8
    state_dim = 16
    hidden_dim = 32
    action_dim = 4
    max_action = 1.0

    params = init_actor_params(k_params, state_dim, action_dim, hidden_dim)
    prepped = prepare_actor_params(params)

    x = jax.random.normal(k_x, (batch, state_dim), jnp.float32)
    out = jax.block_until_ready(actor_forward(x, prepped, max_action, action_dim))
    ref = actor_forward_ref(x, params, max_action)
    assert out.shape == (batch, action_dim)
    assert jnp.allclose(out, ref, atol=2e-3, rtol=0.0), "mismatch vs pure-JAX reference"

    # Ragged-batch path: cdiv grid with a partial last block (no wrapper padding).
    x2 = jax.random.normal(jax.random.PRNGKey(1), (11, state_dim), jnp.float32)
    out2 = jax.block_until_ready(actor_forward(x2, prepped, max_action, action_dim))
    ref2 = actor_forward_ref(x2, params, max_action)
    assert out2.shape == (11, action_dim)
    assert jnp.allclose(out2, ref2, atol=2e-3, rtol=0.0), "ragged-batch mismatch"

    print("KERNEL_OK")
</pallas_src>

<mosaic_0001>
module attributes {stable_mosaic.version = 11 : i64} {
  func.func @actor_kernel(%arg0: i32, %arg1: memref<8x16xf32, #tpu.memory_space<vmem>>, %arg2: memref<16x32xbf16, #tpu.memory_space<vmem>>, %arg3: memref<1x32xf32, #tpu.memory_space<vmem>>, %arg4: memref<1x32xf32, #tpu.memory_space<vmem>>, %arg5: memref<1x32xf32, #tpu.memory_space<vmem>>, %arg6: memref<32x32xbf16, #tpu.memory_space<vmem>>, %arg7: memref<1x32xf32, #tpu.memory_space<vmem>>, %arg8: memref<1x32xf32, #tpu.memory_space<vmem>>, %arg9: memref<1x32xf32, #tpu.memory_space<vmem>>, %arg10: memref<32x128xbf16, #tpu.memory_space<vmem>>, %arg11: memref<1x128xf32, #tpu.memory_space<vmem>>, %arg12: memref<8x4xf32, #tpu.memory_space<vmem>>) attributes {dimension_semantics = [#tpu.dimension_semantics<parallel>], iteration_bounds = array<i64: 1>, scalar_prefetch = 0 : i64, scratch_operands = 0 : i64, tpu.core_type = #tpu.core_type<tc>, window_params = [{transform_indices = @transform_0, window_bounds = array<i64: 8, 16>}, {pipeline_mode = #tpu.pipeline_mode<synchronous>, transform_indices = @transform_1, window_bounds = array<i64: 16, 32>}, {pipeline_mode = #tpu.pipeline_mode<synchronous>, transform_indices = @transform_2, window_bounds = array<i64: 1, 32>}, {pipeline_mode = #tpu.pipeline_mode<synchronous>, transform_indices = @transform_3, window_bounds = array<i64: 1, 32>}, {pipeline_mode = #tpu.pipeline_mode<synchronous>, transform_indices = @transform_4, window_bounds = array<i64: 1, 32>}, {pipeline_mode = #tpu.pipeline_mode<synchronous>, transform_indices = @transform_5, window_bounds = array<i64: 32, 32>}, {pipeline_mode = #tpu.pipeline_mode<synchronous>, transform_indices = @transform_6, window_bounds = array<i64: 1, 32>}, {pipeline_mode = #tpu.pipeline_mode<synchronous>, transform_indices = @transform_7, window_bounds = array<i64: 1, 32>}, {pipeline_mode = #tpu.pipeline_mode<synchronous>, transform_indices = @transform_8, window_bounds = array<i64: 1, 32>}, {pipeline_mode = #tpu.pipeline_mode<synchronous>, transform_indices = @transform_9, window_bounds = array<i64: 32, 128>}, {pipeline_mode = #tpu.pipeline_mode<synchronous>, transform_indices = @transform_10, window_bounds = array<i64: 1, 128>}, {transform_indices = @transform_11, window_bounds = array<i64: 8, 4>}]} {
    %c0 = arith.constant 0 : index
    %c0_0 = arith.constant 0 : index
    %0 = vector.load %arg1[%c0, %c0_0] : memref<8x16xf32, #tpu.memory_space<vmem>>, vector<8x16xf32>
    %1 = arith.truncf %0 : vector<8x16xf32> to vector<8x16xbf16>
    %c0_1 = arith.constant 0 : index
    %c0_2 = arith.constant 0 : index
    %2 = vector.load %arg2[%c0_1, %c0_2] : memref<16x32xbf16, #tpu.memory_space<vmem>>, vector<16x32xbf16>
    %cst = arith.constant dense<0.000000e+00> : vector<8x32xf32>
    %3 = tpu.matmul %1, %2, %cst {dimension_numbers = #tpu.dot_dimension_numbers<[1], [0], [0], [1], [0, 0, 1, 1], [], []>} : vector<8x16xbf16>, vector<16x32xbf16>, vector<8x32xf32> -> vector<8x32xf32>
    %c0_3 = arith.constant 0 : index
    %c0_4 = arith.constant 0 : index
    %4 = vector.load %arg3[%c0_3, %c0_4] : memref<1x32xf32, #tpu.memory_space<vmem>>, vector<1x32xf32>
    %5 = vector.broadcast %4 : vector<1x32xf32> to vector<8x32xf32>
    %6 = arith.addf %3, %5 : vector<8x32xf32>
    %c0_5 = arith.constant 0 : index
    %c0_6 = arith.constant 0 : index
    %7 = vector.load %arg4[%c0_5, %c0_6] : memref<1x32xf32, #tpu.memory_space<vmem>>, vector<1x32xf32>
    %c0_7 = arith.constant 0 : index
    %c0_8 = arith.constant 0 : index
    %8 = vector.load %arg5[%c0_7, %c0_8] : memref<1x32xf32, #tpu.memory_space<vmem>>, vector<1x32xf32>
    %cst_9 = arith.constant dense<0.000000e+00> : vector<8xf32>
    %9 = vector.multi_reduction <add>, %6, %cst_9 [1] : vector<8x32xf32> to vector<8xf32>
    %10 = vector.shape_cast %9 : vector<8xf32> to vector<8x1xf32>
    %cst_10 = arith.constant 3.200000e+01 : f32
    %11 = vector.broadcast %cst_10 : f32 to vector<8x1xf32>
    %12 = arith.divf %10, %11 : vector<8x1xf32>
    %13 = arith.mulf %6, %6 : vector<8x32xf32>
    %cst_11 = arith.constant dense<0.000000e+00> : vector<8xf32>
    %14 = vector.multi_reduction <add>, %13, %cst_11 [1] : vector<8x32xf32> to vector<8xf32>
    %15 = vector.shape_cast %14 : vector<8xf32> to vector<8x1xf32>
    %cst_12 = arith.constant 3.200000e+01 : f32
    %16 = vector.broadcast %cst_12 : f32 to vector<8x1xf32>
    %17 = arith.divf %15, %16 : vector<8x1xf32>
    %18 = arith.mulf %12, %12 : vector<8x1xf32>
    %19 = arith.subf %17, %18 : vector<8x1xf32>
    %cst_13 = arith.constant 0.000000e+00 : f32
    %20 = vector.broadcast %cst_13 : f32 to vector<8x1xf32>
    %21 = arith.maximumf %19, %20 : vector<8x1xf32>
    %cst_14 = arith.constant 9.99999974E-6 : f32
    %22 = vector.broadcast %cst_14 : f32 to vector<8x1xf32>
    %23 = arith.addf %21, %22 : vector<8x1xf32>
    %24 = math.rsqrt %23 : vector<8x1xf32>
    %25 = vector.broadcast %24 : vector<8x1xf32> to vector<8x32xf32>
    %26 = vector.broadcast %7 : vector<1x32xf32> to vector<8x32xf32>
    %27 = arith.mulf %25, %26 : vector<8x32xf32>
    %28 = arith.mulf %6, %27 : vector<8x32xf32>
    %29 = vector.broadcast %12 : vector<8x1xf32> to vector<8x32xf32>
    %30 = arith.mulf %29, %27 : vector<8x32xf32>
    %31 = vector.broadcast %8 : vector<1x32xf32> to vector<8x32xf32>
    %32 = arith.subf %31, %30 : vector<8x32xf32>
    %33 = arith.addf %28, %32 : vector<8x32xf32>
    %cst_15 = arith.constant 0.000000e+00 : f32
    %34 = vector.broadcast %cst_15 : f32 to vector<8x32xf32>
    %35 = arith.maximumf %33, %34 : vector<8x32xf32>
    %36 = arith.truncf %35 : vector<8x32xf32> to vector<8x32xbf16>
    %c0_16 = arith.constant 0 : index
    %c0_17 = arith.constant 0 : index
    %37 = vector.load %arg6[%c0_16, %c0_17] : memref<32x32xbf16, #tpu.memory_space<vmem>>, vector<32x32xbf16>
    %cst_18 = arith.constant dense<0.000000e+00> : vector<8x32xf32>
    %38 = tpu.matmul %36, %37, %cst_18 {dimension_numbers = #tpu.dot_dimension_numbers<[1], [0], [0], [1], [0, 0, 1, 1], [], []>} : vector<8x32xbf16>, vector<32x32xbf16>, vector<8x32xf32> -> vector<8x32xf32>
    %c0_19 = arith.constant 0 : index
    %c0_20 = arith.constant 0 : index
    %39 = vector.load %arg7[%c0_19, %c0_20] : memref<1x32xf32, #tpu.memory_space<vmem>>, vector<1x32xf32>
    %40 = vector.broadcast %39 : vector<1x32xf32> to vector<8x32xf32>
    %41 = arith.addf %38, %40 : vector<8x32xf32>
    %c0_21 = arith.constant 0 : index
    %c0_22 = arith.constant 0 : index
    %42 = vector.load %arg8[%c0_21, %c0_22] : memref<1x32xf32, #tpu.memory_space<vmem>>, vector<1x32xf32>
    %c0_23 = arith.constant 0 : index
    %c0_24 = arith.constant 0 : index
    %43 = vector.load %arg9[%c0_23, %c0_24] : memref<1x32xf32, #tpu.memory_space<vmem>>, vector<1x32xf32>
    %cst_25 = arith.constant dense<0.000000e+00> : vector<8xf32>
    %44 = vector.multi_reduction <add>, %41, %cst_25 [1] : vector<8x32xf32> to vector<8xf32>
    %45 = vector.shape_cast %44 : vector<8xf32> to vector<8x1xf32>
    %cst_26 = arith.constant 3.200000e+01 : f32
    %46 = vector.broadcast %cst_26 : f32 to vector<8x1xf32>
    %47 = arith.divf %45, %46 : vector<8x1xf32>
    %48 = arith.mulf %41, %41 : vector<8x32xf32>
    %cst_27 = arith.constant dense<0.000000e+00> : vector<8xf32>
    %49 = vector.multi_reduction <add>, %48, %cst_27 [1] : vector<8x32xf32> to vector<8xf32>
    %50 = vector.shape_cast %49 : vector<8xf32> to vector<8x1xf32>
    %cst_28 = arith.constant 3.200000e+01 : f32
    %51 = vector.broadcast %cst_28 : f32 to vector<8x1xf32>
    %52 = arith.divf %50, %51 : vector<8x1xf32>
    %53 = arith.mulf %47, %47 : vector<8x1xf32>
    %54 = arith.subf %52, %53 : vector<8x1xf32>
    %cst_29 = arith.constant 0.000000e+00 : f32
    %55 = vector.broadcast %cst_29 : f32 to vector<8x1xf32>
    %56 = arith.maximumf %54, %55 : vector<8x1xf32>
    %cst_30 = arith.constant 9.99999974E-6 : f32
    %57 = vector.broadcast %cst_30 : f32 to vector<8x1xf32>
    %58 = arith.addf %56, %57 : vector<8x1xf32>
    %59 = math.rsqrt %58 : vector<8x1xf32>
    %60 = vector.broadcast %59 : vector<8x1xf32> to vector<8x32xf32>
    %61 = vector.broadcast %42 : vector<1x32xf32> to vector<8x32xf32>
    %62 = arith.mulf %60, %61 : vector<8x32xf32>
    %63 = arith.mulf %41, %62 : vector<8x32xf32>
    %64 = vector.broadcast %47 : vector<8x1xf32> to vector<8x32xf32>
    %65 = arith.mulf %64, %62 : vector<8x32xf32>
    %66 = vector.broadcast %43 : vector<1x32xf32> to vector<8x32xf32>
    %67 = arith.subf %66, %65 : vector<8x32xf32>
    %68 = arith.addf %63, %67 : vector<8x32xf32>
    %cst_31 = arith.constant 0.000000e+00 : f32
    %69 = vector.broadcast %cst_31 : f32 to vector<8x32xf32>
    %70 = arith.maximumf %68, %69 : vector<8x32xf32>
    %71 = arith.truncf %70 : vector<8x32xf32> to vector<8x32xbf16>
    %c0_32 = arith.constant 0 : index
    %c0_33 = arith.constant 0 : index
    %72 = vector.load %arg10[%c0_32, %c0_33] : memref<32x128xbf16, #tpu.memory_space<vmem>>, vector<32x128xbf16>
    %cst_34 = arith.constant dense<0.000000e+00> : vector<8x128xf32>
    %73 = tpu.matmul %71, %72, %cst_34 {dimension_numbers = #tpu.dot_dimension_numbers<[1], [0], [0], [1], [0, 0, 1, 1], [], []>} : vector<8x32xbf16>, vector<32x128xbf16>, vector<8x128xf32> -> vector<8x128xf32>
    %c0_35 = arith.constant 0 : index
    %c0_36 = arith.constant 0 : index
    %74 = vector.load %arg11[%c0_35, %c0_36] : memref<1x128xf32, #tpu.memory_space<vmem>>, vector<1x128xf32>
    %75 = vector.broadcast %74 : vector<1x128xf32> to vector<8x128xf32>
    %76 = arith.addf %73, %75 : vector<8x128xf32>
    %77 = math.tanh %76 : vector<8x128xf32>
    %cst_37 = arith.constant 1.000000e+00 : f32
    %78 = vector.broadcast %cst_37 : f32 to vector<8x128xf32>
    %79 = arith.mulf %77, %78 : vector<8x128xf32>
    %80 = vector.extract_strided_slice %79 {offsets = [0, 0], sizes = [8, 4], strides = [1, 1]} : vector<8x128xf32> to vector<8x4xf32>
    %c0_38 = arith.constant 0 : index
    %c0_39 = arith.constant 0 : index
    %81 = vector.load %arg12[%c0_38, %c0_39] : memref<8x4xf32, #tpu.memory_space<vmem>>, vector<8x4xf32>
    tpu.vector_store %arg12[%c0_38, %c0_39], %80 {strides = array<i32>} : memref<8x4xf32, #tpu.memory_space<vmem>>, vector<8x4xf32>,
    return
  }
  func.func @transform_0(%arg0: i32) -> (i32, i32) {
    %c0_i32 = arith.constant 0 : i32
    %c0_i32_0 = arith.constant 0 : i32
    return %arg0, %c0_i32 : i32, i32
  }
  func.func @transform_1(%arg0: i32) -> (i32, i32) {
    %c0_i32 = arith.constant 0 : i32
    %c0_i32_0 = arith.constant 0 : i32
    %c0_i32_1 = arith.constant 0 : i32
    return %c0_i32, %c0_i32_0 : i32, i32
  }
  func.func @transform_2(%arg0: i32) -> (i32, i32) {
    %c0_i32 = arith.constant 0 : i32
    %c0_i32_0 = arith.constant 0 : i32
    %c0_i32_1 = arith.constant 0 : i32
    return %c0_i32, %c0_i32_0 : i32, i32
  }
  func.func @transform_3(%arg0: i32) -> (i32, i32) {
    %c0_i32 = arith.constant 0 : i32
    %c0_i32_0 = arith.constant 0 : i32
    %c0_i32_1 = arith.constant 0 : i32
    return %c0_i32, %c0_i32_0 : i32, i32
  }
  func.func @transform_4(%arg0: i32) -> (i32, i32) {
    %c0_i32 = arith.constant 0 : i32
    %c0_i32_0 = arith.constant 0 : i32
    %c0_i32_1 = arith.constant 0 : i32
    return %c0_i32, %c0_i32_0 : i32, i32
  }
  func.func @transform_5(%arg0: i32) -> (i32, i32) {
    %c0_i32 = arith.constant 0 : i32
    %c0_i32_0 = arith.constant 0 : i32
    %c0_i32_1 = arith.constant 0 : i32
    return %c0_i32, %c0_i32_0 : i32, i32
  }
  func.func @transform_6(%arg0: i32) -> (i32, i32) {
    %c0_i32 = arith.constant 0 : i32
    %c0_i32_0 = arith.constant 0 : i32
    %c0_i32_1 = arith.constant 0 : i32
    return %c0_i32, %c0_i32_0 : i32, i32
  }
  func.func @transform_7(%arg0: i32) -> (i32, i32) {
    %c0_i32 = arith.constant 0 : i32
    %c0_i32_0 = arith.constant 0 : i32
    %c0_i32_1 = arith.constant 0 : i32
    return %c0_i32, %c0_i32_0 : i32, i32
  }
  func.func @transform_8(%arg0: i32) -> (i32, i32) {
    %c0_i32 = arith.constant 0 : i32
    %c0_i32_0 = arith.constant 0 : i32
    %c0_i32_1 = arith.constant 0 : i32
    return %c0_i32, %c0_i32_0 : i32, i32
  }
  func.func @transform_9(%arg0: i32) -> (i32, i32) {
    %c0_i32 = arith.constant 0 : i32
    %c0_i32_0 = arith.constant 0 : i32
    %c0_i32_1 = arith.constant 0 : i32
    return %c0_i32, %c0_i32_0 : i32, i32
  }
  func.func @transform_10(%arg0: i32) -> (i32, i32) {
    %c0_i32 = arith.constant 0 : i32
    %c0_i32_0 = arith.constant 0 : i32
    %c0_i32_1 = arith.constant 0 : i32
    return %c0_i32, %c0_i32_0 : i32, i32
  }
  func.func @transform_11(%arg0: i32) -> (i32, i32) {
    %c0_i32 = arith.constant 0 : i32
    %c0_i32_0 = arith.constant 0 : i32
    return %arg0, %c0_i32 : i32, i32
  }
}

</mosaic_0001>

<bundles_post_ra>
// kernel: _actor_forward_impl.1
= control target key start
LH: loop header
LB: loop body
LE: loop exit
PB: predicated region body
PF: predicated region fallthrough
CT: control target
= control target key end

     0   :  { %16 = vsyncpa [#allocation3], 0  ;;  %s1054_s0 = inlined_call_operand.hbm [shape: f32[8,16], index: 0, kind: input, shape index: {}]   ;;  %s1055_s1 = inlined_call_operand.hbm [shape: bf16[16,32], index: 1, kind: input, shape index: {}]   ;;  %s1056_s2 = inlined_call_operand.hbm [shape: f32[1,32], index: 2, kind: input, shape index: {}]   ;;  %s1057_s3 = inlined_call_operand.hbm [shape: f32[1,32], index: 3, kind: input, shape index: {}]   ;;  %s1058_s4 = inlined_call_operand.hbm [shape: f32[1,32], index: 4, kind: input, shape index: {}]   ;;  %s1059_s5 = inlined_call_operand.hbm [shape: bf16[32,32], index: 5, kind: input, shape index: {}]   ;;  %s1060_s6 = inlined_call_operand.hbm [shape: f32[1,32], index: 6, kind: input, shape index: {}]   ;;  %s1061_s7 = inlined_call_operand.hbm [shape: f32[1,32], index: 7, kind: input, shape index: {}]   ;;  %s1062_s8 = inlined_call_operand.hbm [shape: f32[1,32], index: 8, kind: input, shape index: {}]   ;;  %s1063_s9 = inlined_call_operand.hbm [shape: bf16[32,128], index: 9, kind: input, shape index: {}]   ;;  %s1064_s10 = inlined_call_operand.hbm [shape: f32[1,128], index: 10, kind: input, shape index: {}]   ;;  %s1065_s11 = inlined_call_operand.hbm [shape: f32[8,4], index: 11, kind: output, shape index: {}]  }
   0x1   :  { %17 = vsyncpa [#allocation6], 0 }
   0x2   :  { %18 = vsyncpa [#allocation9], 0 }
   0x3   :  { %19 = vsyncpa [#allocation12], 0 }
   0x4   :  { %20 = vsyncpa [#allocation15], 0 }
   0x5   :  { %21 = vsyncpa [#allocation18], 0 }
   0x6   :  { %22 = vsyncpa [#allocation4], 0  ;;  %s811_s17 = smov [#allocation5]   ;;  %s533_s21 = scalar_lea.hbm %s1055_s1, 128 }
   0x7   :  { %s38_s18 = sshll.u32 %s811_s17, 4  ;;  %p534_p0 = scmp.ne.s32.totalorder %s1055_s1, %s533_s21  ;;  %s39_s18 = int_to_ptr.vmem [resolvable:$true] %s38_s18 }
   0x8   :  { %p537_p1 = scmp.lt.u32.totalorder %s533_s21, %s1055_s1 }
   0xa   :  { %p539_p2 = pnand %p537_p1, %p534_p0 }
   0xc   :  { %542 = shalt.err (!%p539_p2)
}
   0xd   :  { %s543_s26 = scalar_lea.vmem %s39_s18, 128  ;;  %p548_p4 = scmp.lt.s32.totalorder %s39_s18, %s39_s18 }
   0xe   :  { %p544_p3 = scmp.ne.s32.totalorder %s39_s18, %s543_s26  ;;  %p549_p5 = scmp.lt.s32.totalorder %s543_s26, %s543_s26 }
  0x10   :  { %p550_p6 = por %p549_p5, %p548_p4 }
  0x12   :  { %p551_p7 = pnand %p550_p6, %p544_p3 }
  0x14   :  { %554 = shalt.err (!%p551_p7)
}
  0x15   :  { %s812_s27 = smov 64   ;;  %s813_s28 = smov 4  }
  0x16   :  { %44 = dma.hbm_to_vmem [thread:$0]  %s1055_s1, 128, %s39_s18, [#allocation6], %s812_s27, %s812_s27, %s813_s28  }
  0x17   :  { %s814_s12 = smov [#allocation8]   ;;  %s815_s14 = smov [#allocation11]  }
  0x18   :  { %s61_s13 = sshll.u32 %s814_s12, 4  ;;  %s80_s15 = sshll.u32 %s815_s14, 4  ;;  %s62_s13 = int_to_ptr.vmem [resolvable:$true] %s61_s13  ;;  %s81_s15 = int_to_ptr.vmem [resolvable:$true] %s80_s15 }
  0x19   :  { %s555_s19 = scalar_lea.hbm %s1057_s3, 16 }
  0x1a   :  { %p556_p8 = scmp.ne.s32.totalorder %s1057_s3, %s555_s19  ;;  %p559_p9 = scmp.lt.u32.totalorder %s555_s19, %s1057_s3 }
  0x1c   :  { %p561_p10 = pnand %p559_p9, %p556_p8 }
  0x1e   :  { %564 = shalt.err (!%p561_p10)
}
  0x1f   :  { %s565_s1 = scalar_lea.vmem %s62_s13, 16  ;;  %s569_s18 = scalar_lea.vmem %s62_s13, 32 }
  0x20   :  { %p566_p11 = scmp.ne.s32.totalorder %s62_s13, %s565_s1  ;;  %p570_p12 = scmp.lt.s32.totalorder %s62_s13, %s62_s13 }
  0x21   :  { %p571_p13 = scmp.lt.s32.totalorder %s569_s18, %s565_s1 }
  0x23   :  { %p572_p0 = por %p571_p13, %p570_p12 }
  0x25   :  { %p573_p1 = pnand %p572_p0, %p566_p11 }
  0x27   :  { %576 = shalt.err (!%p573_p1)
}
  0x28   :  { %64 = dma.hbm_to_vmem [thread:$0]  %s1057_s3, 16, %s62_s13, [#allocation9]  }
  0x29   :  { %s577_s30 = scalar_lea.hbm %s1059_s5, 256 }
  0x2a   :  { %p578_p2 = scmp.ne.s32.totalorder %s1059_s5, %s577_s30  ;;  %p581_p3 = scmp.lt.u32.totalorder %s577_s30, %s1059_s5 }
  0x2c   :  { %p583_p4 = pnand %p581_p3, %p578_p2 }
  0x2e   :  { %586 = shalt.err (!%p583_p4)
}
  0x2f   :  { %s587_s19 = scalar_lea.vmem %s81_s15, 256  ;;  %p592_p6 = scmp.lt.s32.totalorder %s81_s15, %s81_s15 }
  0x30   :  { %p588_p5 = scmp.ne.s32.totalorder %s81_s15, %s587_s19  ;;  %p593_p7 = scmp.lt.s32.totalorder %s587_s19, %s587_s19 }
  0x32   :  { %p594_p8 = por %p593_p7, %p592_p6 }
  0x34   :  { %p595_p9 = pnand %p594_p8, %p588_p5 }
  0x36   :  { %598 = shalt.err (!%p595_p9)
}
  0x37   :  { %86 = dma.hbm_to_vmem [thread:$0]  %s1059_s5, 256, %s81_s15, [#allocation12], %s812_s27, %s812_s27, %s813_s28  }
  0x38   :  { %s816_s20 = smov [#allocation14]   ;;  %s817_s22 = smov [#allocation17]  }
  0x39   :  { %s103_s21 = sshll.u32 %s816_s20, 4  ;;  %s122_s23 = sshll.u32 %s817_s22, 4  ;;  %s104_s21 = int_to_ptr.vmem [resolvable:$true] %s103_s21  ;;  %s123_s23 = int_to_ptr.vmem [resolvable:$true] %s122_s23 }
  0x3a   :  { %s599_s24 = scalar_lea.hbm %s1061_s7, 16 }
  0x3b   :  { %p600_p10 = scmp.ne.s32.totalorder %s1061_s7, %s599_s24  ;;  %p603_p11 = scmp.lt.u32.totalorder %s599_s24, %s1061_s7 }
  0x3d   :  { %p605_p12 = pnand %p603_p11, %p600_p10 }
  0x3f   :  { %608 = shalt.err (!%p605_p12)
}
  0x40   :  { %s609_s5 = scalar_lea.vmem %s104_s21, 16  ;;  %s613_s15 = scalar_lea.vmem %s104_s21, 32 }
  0x41   :  { %p610_p13 = scmp.ne.s32.totalorder %s104_s21, %s609_s5  ;;  %p614_p0 = scmp.lt.s32.totalorder %s104_s21, %s104_s21 }
  0x42   :  { %p615_p1 = scmp.lt.s32.totalorder %s613_s15, %s609_s5 }
  0x44   :  { %p616_p2 = por %p615_p1, %p614_p0 }
  0x46   :  { %p617_p3 = pnand %p616_p2, %p610_p13 }
  0x48   :  { %620 = shalt.err (!%p617_p3)
}
  0x49   :  { %106 = dma.hbm_to_vmem [thread:$0]  %s1061_s7, 16, %s104_s21, [#allocation15]  }
  0x4a   :  { %s621_s19 = scalar_lea.hbm %s1063_s9, 256 }
  0x4b   :  { %p622_p4 = scmp.ne.s32.totalorder %s1063_s9, %s621_s19  ;;  %p625_p5 = scmp.lt.u32.totalorder %s621_s19, %s1063_s9 }
  0x4d   :  { %p627_p6 = pnand %p625_p5, %p622_p4 }
  0x4f   :  { %630 = shalt.err (!%p627_p6)
}
  0x50   :  { %s631_s1 = scalar_lea.vmem %s123_s23, 256  ;;  %p636_p8 = scmp.lt.s32.totalorder %s123_s23, %s123_s23 }
  0x51   :  { %p632_p7 = scmp.ne.s32.totalorder %s123_s23, %s631_s1  ;;  %p637_p9 = scmp.lt.s32.totalorder %s631_s1, %s631_s1 }
  0x53   :  { %p638_p10 = por %p637_p9, %p636_p8 }
  0x55   :  { %p639_p11 = pnand %p638_p10, %p632_p7 }
  0x57   :  { %642 = shalt.err (!%p639_p11)
}
  0x58   :  { %128 = dma.hbm_to_vmem [thread:$0]  %s1063_s9, 256, %s123_s23, [#allocation18], %s812_s27, %s812_s27, %s813_s28  }
  0x59   :  { %s818_s18 = smov [#allocation2]   ;;  %s819_s25 = smov [#allocation7]  }
  0x5a   :  { %s29_s24 = sshll.u32 %s818_s18, 4  ;;  %s51_s26 = sshll.u32 %s819_s25, 4  ;;  %s30_s24 = int_to_ptr.vmem [resolvable:$true] %s29_s24  ;;  %s52_s26 = int_to_ptr.vmem [resolvable:$true] %s51_s26 }
  0x5b   :  { %s643_s5 = scalar_lea.hbm %s1054_s0, 128 }
  0x5c   :  { %p644_p12 = scmp.ne.s32.totalorder %s1054_s0, %s643_s5  ;;  %p647_p13 = scmp.lt.u32.totalorder %s643_s5, %s1054_s0 }
  0x5e   :  { %p649_p0 = pnand %p647_p13, %p644_p12 }
  0x60   :  { %652 = shalt.err (!%p649_p0)
}
  0x61   :  { %s653_s9 = scalar_lea.vmem %s30_s24, 128  ;;  %p658_p2 = scmp.lt.s32.totalorder %s30_s24, %s30_s24 }
  0x62   :  { %p654_p1 = scmp.ne.s32.totalorder %s30_s24, %s653_s9  ;;  %p659_p3 = scmp.lt.s32.totalorder %s653_s9, %s653_s9 }
  0x64   :  { %p660_p4 = por %p659_p3, %p658_p2 }
  0x66   :  { %p661_p5 = pnand %p660_p4, %p654_p1 }
  0x68   :  { %664 = shalt.err (!%p661_p5)
}
  0x69   :  { %32 = dma.hbm_to_vmem [thread:$0]  %s1054_s0, 128, %s30_s24, [#allocation3]  }
  0x6a   :  { %s665_s19 = scalar_lea.hbm %s1056_s2, 16 }
  0x6b   :  { %p666_p6 = scmp.ne.s32.totalorder %s1056_s2, %s665_s19  ;;  %p669_p7 = scmp.lt.u32.totalorder %s665_s19, %s1056_s2 }
  0x6d   :  { %p671_p8 = pnand %p669_p7, %p666_p6 }
  0x6f   :  { %674 = shalt.err (!%p671_p8)
}
  0x70   :  { %s675_s1 = scalar_lea.vmem %s52_s26, 16  ;;  %s679_s7 = scalar_lea.vmem %s52_s26, 32 }
  0x71   :  { %p676_p9 = scmp.ne.s32.totalorder %s52_s26, %s675_s1  ;;  %p680_p10 = scmp.lt.s32.totalorder %s52_s26, %s52_s26 }
  0x72   :  { %p681_p11 = scmp.lt.s32.totalorder %s679_s7, %s675_s1 }
  0x74   :  { %p682_p12 = por %p681_p11, %p680_p10 }
  0x76   :  { %p683_p13 = pnand %p682_p12, %p676_p9 }
  0x78   :  { %686 = shalt.err (!%p683_p13)
}
  0x79   :  { %54 = dma.hbm_to_vmem [thread:$0]  %s1056_s2, 16, %s52_s26, [#allocation6]  }
  0x7a   :  { %s820_s18 = smov [#allocation10]   ;;  %s821_s25 = smov [#allocation13]  }
  0x7b   :  { %s71_s24 = sshll.u32 %s820_s18, 4  ;;  %s93_s29 = sshll.u32 %s821_s25, 4  ;;  %s72_s24 = int_to_ptr.vmem [resolvable:$true] %s71_s24  ;;  %s94_s29 = int_to_ptr.vmem [resolvable:$true] %s93_s29 }
  0x7c   :  { %s687_s15 = scalar_lea.hbm %s1058_s4, 16 }
  0x7d   :  { %p688_p0 = scmp.ne.s32.totalorder %s1058_s4, %s687_s15  ;;  %p691_p1 = scmp.lt.u32.totalorder %s687_s15, %s1058_s4 }
  0x7f   :  { %p693_p2 = pnand %p691_p1, %p688_p0 }
  0x81   :  { %696 = shalt.err (!%p693_p2)
}
  0x82   :  { %s697_s2 = scalar_lea.vmem %s72_s24, 16  ;;  %s701_s26 = scalar_lea.vmem %s72_s24, 32 }
  0x83   :  { %p698_p3 = scmp.ne.s32.totalorder %s72_s24, %s697_s2  ;;  %p702_p4 = scmp.lt.s32.totalorder %s72_s24, %s72_s24 }
  0x84   :  { %p703_p5 = scmp.lt.s32.totalorder %s701_s26, %s697_s2 }
  0x86   :  { %p704_p6 = por %p703_p5, %p702_p4 }
  0x88   :  { %p705_p7 = pnand %p704_p6, %p698_p3 }
  0x8a   :  { %708 = shalt.err (!%p705_p7)
}
  0x8b   :  { %74 = dma.hbm_to_vmem [thread:$0]  %s1058_s4, 16, %s72_s24, [#allocation9]  }
  0x8c   :  { %s709_s19 = scalar_lea.hbm %s1060_s6, 16 }
  0x8d   :  { %p710_p8 = scmp.ne.s32.totalorder %s1060_s6, %s709_s19  ;;  %p713_p9 = scmp.lt.u32.totalorder %s709_s19, %s1060_s6 }
  0x8f   :  { %p715_p10 = pnand %p713_p9, %p710_p8 }
  0x91   :  { %718 = shalt.err (!%p715_p10)
}
  0x92   :  { %s719_s1 = scalar_lea.vmem %s94_s29, 16  ;;  %s723_s7 = scalar_lea.vmem %s94_s29, 32 }
  0x93   :  { %p720_p11 = scmp.ne.s32.totalorder %s94_s29, %s719_s1  ;;  %p724_p12 = scmp.lt.s32.totalorder %s94_s29, %s94_s29 }
  0x94   :  { %p725_p13 = scmp.lt.s32.totalorder %s723_s7, %s719_s1 }
  0x96   :  { %p726_p0 = por %p725_p13, %p724_p12 }
  0x98   :  { %p727_p1 = pnand %p726_p0, %p720_p11 }
  0x9a   :  { %730 = shalt.err (!%p727_p1)
}
  0x9b   :  { %96 = dma.hbm_to_vmem [thread:$0]  %s1060_s6, 16, %s94_s29, [#allocation12]  }
  0x9c   :  { %s822_s21 = smov [#allocation16]   ;;  %s823_s24 = smov [#allocation19]  }
  0x9d   :  { %s113_s18 = sshll.u32 %s822_s21, 4  ;;  %s135_s25 = sshll.u32 %s823_s24, 4  ;;  %s114_s18 = int_to_ptr.vmem [resolvable:$true] %s113_s18  ;;  %s136_s25 = int_to_ptr.vmem [resolvable:$true] %s135_s25 }
  0x9e   :  { %s731_s15 = scalar_lea.hbm %s1062_s8, 16 }
  0x9f   :  { %p732_p2 = scmp.ne.s32.totalorder %s1062_s8, %s731_s15  ;;  %p735_p3 = scmp.lt.u32.totalorder %s731_s15, %s1062_s8 }
  0xa1   :  { %p737_p4 = pnand %p735_p3, %p732_p2 }
  0xa3   :  { %740 = shalt.err (!%p737_p4)
}
  0xa4   :  { %s741_s6 = scalar_lea.vmem %s114_s18, 16  ;;  %s745_s29 = scalar_lea.vmem %s114_s18, 32 }
  0xa5   :  { %p742_p5 = scmp.ne.s32.totalorder %s114_s18, %s741_s6  ;;  %p746_p6 = scmp.lt.s32.totalorder %s114_s18, %s114_s18 }
  0xa6   :  { %p747_p7 = scmp.lt.s32.totalorder %s745_s29, %s741_s6 }
  0xa8   :  { %p748_p8 = por %p747_p7, %p746_p6 }
  0xaa   :  { %p749_p9 = pnand %p748_p8, %p742_p5 }
  0xac   :  { %752 = shalt.err (!%p749_p9)
}
  0xad   :  { %116 = dma.hbm_to_vmem [thread:$0]  %s1062_s8, 16, %s114_s18, [#allocation15]  }
  0xae   :  { %s753_s23 = scalar_lea.hbm %s1064_s10, 16 }
  0xaf   :  { %p754_p10 = scmp.ne.s32.totalorder %s1064_s10, %s753_s23  ;;  %p757_p11 = scmp.lt.u32.totalorder %s753_s23, %s1064_s10 }
  0xb1   :  { %p759_p12 = pnand %p757_p11, %p754_p10 }
  0xb3   :  { %762 = shalt.err (!%p759_p12)
}
  0xb4   :  { %s763_s20 = scalar_lea.vmem %s136_s25, 16  ;;  %s767_s22 = scalar_lea.vmem %s136_s25, 32 }
  0xb5   :  { %p764_p13 = scmp.ne.s32.totalorder %s136_s25, %s763_s20  ;;  %p768_p0 = scmp.lt.s32.totalorder %s136_s25, %s136_s25 }
  0xb6   :  { %p769_p1 = scmp.lt.s32.totalorder %s767_s22, %s763_s20 }
  0xb8   :  { %p770_p2 = por %p769_p1, %p768_p0 }
  0xba   :  { %p771_p3 = pnand %p770_p2, %p764_p13 }
  0xbc   :  { %774 = shalt.err (!%p771_p3)
}
  0xbd   :  { %138 = dma.hbm_to_vmem [thread:$0]  %s1064_s10, 16, %s136_s25, [#allocation18]  }
  0xbe   :  { %797 = dma.done.wait [#allocation3], 128  }
  0xbf   :  { %798 = vsyncadd [#allocation3], 4294967168 }
  0xc0   :  { %799 = dma.done.wait [#allocation6], 144  }
  0xc1   :  { %800 = vsyncadd [#allocation6], 4294967152 }
  0xc2   :  { %801 = dma.done.wait [#allocation9], 32  }
  0xc3   :  { %802 = vsyncadd [#allocation9], 4294967264 }
  0xc4   :  { %803 = dma.done.wait [#allocation12], 272  }
  0xc5   :  { %804 = vsyncadd [#allocation12], 4294967024 }
  0xc6   :  { %805 = dma.done.wait [#allocation15], 32  }
  0xc7   :  { %806 = vsyncadd [#allocation15], 4294967264 }
  0xc8   :  { %807 = dma.done.wait [#allocation18], 272  }
  0xc9   :  { %808 = vsyncadd [#allocation18], 4294967024  ;;  %v824_v0 = vmov 0.0   ;;  %vm825_vm0 = vmmov 0   ;;  %v522_v1 = vld [vmem:[#allocation5] sm:$0xff]   ;;  %v173_v2 = vld [vmem:[#allocation2] sm:$0xff] }
  0xca   :  { %484 = vmatprep.subr.bf16.mxu0 %v824_v0  ;;  %486 = vmatprep.mubr.msk.bf16.mxu0 %vm825_vm0, %v824_v0  ;;  %vm190_vm1 = vcmask 130048   ;;  %v174_v3 = vpack.c.bf16 %v173_v2, %v173_v2  ;;  %v461_v4 = vld [vmem:[#allocation7] ss:$0 sm:$0xff]  ;;  %vm236_vm2 = vcmask 261120   ;;  %v523_v13 = vld [vmem:[#allocation11] sm:$0xff]   ;;  %v524_v14 = vld [vmem:[#allocation11 + $0x8] sm:$0xff]  }
  0xcb   :  { %490 = vmatprep.subr.bf16.mxu1 %v824_v0  ;;  %494 = vmatprep.mubr.msk.bf16.mxu1 %vm825_vm0, %v824_v0  ;;  %v464_v23 = vld [vmem:[#allocation8] ss:$0 sm:$0xff]  ;;  %v465_v26 = vld [vmem:[#allocation10] ss:$0 sm:$0xff]  ;;  %v466_v33 = vld [vmem:[#allocation13] ss:$0 sm:$0xff] }
  0xcc   :  { %485 = vmatpush3.bf16.msra.mxu0 %v522_v1  ;;  %491 = vmatpush3.bf16.msra.mxu1 %v523_v13  ;;  %v525_v42 = vld [vmem:[#allocation17] sm:$0xff]   ;;  %v526_v43 = vld [vmem:[#allocation17 + $0x8] sm:$0xff]   ;;  %v470_v52 = vld [vmem:[#allocation14] ss:$0 sm:$0xff]  ;;  %s826_s10 = smov [#allocation20]   ;;  %vm439_vm3 = vcmask 31744  }
  0xcd   :  { %498 = vmatprep.subr.bf16.mxu0 %v824_v0  ;;  %492 = vmatprep.subr.bf16.mxu1 %v824_v0  ;;  %v471_v55 = vld [vmem:[#allocation16] ss:$0 sm:$0xff]  ;;  %v472_v62 = vld [vmem:[#allocation19] ss:$0 sm:$0xff]  ;;  %s447_s7 = sshll.u32 %s826_s10, 4  ;;  %s448_s7 = int_to_ptr.vmem [resolvable:$true] %s447_s7 }
  0xce   :  { %s775_s4 = scalar_lea.vmem %s448_s7, 128  ;;  %p780_p5 = scmp.lt.s32.totalorder %s448_s7, %s448_s7 }
  0xcf   :  { %487 = vmatmul.mubr.msk.bf16.vlgmr.msra.gmra.mrb[0].mxu0 %vm190_vm1, %v174_v3  ;;  %p776_p4 = scmp.ne.s32.totalorder %s448_s7, %s775_s4  ;;  %p781_p6 = scmp.lt.s32.totalorder %s775_s4, %s775_s4 }
  0xd0   :  { %502 = vmatprep.mubr.msk.bf16.mxu0 %vm825_vm0, %v824_v0  ;;  %493 = vmatpush3.bf16.msra.mxu1 %v524_v14 }
  0xd1   :  { %499 = vmatpush3.bf16.msra.mxu0 %v525_v42  ;;  %p782_p7 = por %p781_p6, %p780_p5 }
  0xd2   :  { %500 = vmatprep.subr.bf16.mxu0 %v824_v0 }
  0xd3   :  { %p783_p8 = pnand %p782_p7, %p776_p4 }
  0xd5   :  { %501 = vmatpush3.bf16.msra.mxu0 %v526_v43 }
 0x1a2   :  { %v228_v5 = vpop.f32.mrb[0].mxu0 }
 0x1a3   :  { %v229_v6 = vadd.f32 %v461_v4, %v228_v5  ;;  %v488_v7 = vpop.f32.mrb[1].mxu0 }
 0x1a4   :  { %v231_v8 = vpop.f32.mrb[2].mxu0 }
 0x1a5   :  { %v489_v9 = vpop.f32.mrb[3].mxu0  ;;  %v237_v10 = vsel %vm236_vm2, %v229_v6, 0.0  ;;  %v242_v11 = vmul.f32 %v229_v6, %v229_v6 }
 0x1a6   :  { %238 = vadd.xlane.f32.xlu0 %v237_v10 }
 0x1a7   :  { %v243_v12 = vsel %vm236_vm2, %v242_v11, 0.0 }
 0x1aa   :  { %244 = vadd.xlane.f32.xlu0 %v243_v12 }
 0x233   :  { %v239_v15 = vpop.xlane.xlu0 %238 }
 0x234   :  { %v241_v16 = vmul.f32 0.03125, %v239_v15 }
 0x236   :  { %v247_v18 = vmul.f32 %v241_v16, %v241_v16 }
 0x237   :  { %v245_v17 = vpop.xlane.xlu0 %244 }
 0x238   :  { %v246_v19 = vmul.f32 0.03125, %v245_v17 }
 0x23a   :  { %v248_v20 = vsub.f32 %v246_v19, %v247_v18 }
 0x23c   :  { %v249_v21 = vmax.f32 %v248_v20, 0.0 }
 0x23e   :  { %v250_v22 = vadd.f32 1e-05, %v249_v21 }
 0x240   :  { %527 = vrsqrt.f32 %v250_v22 }
 0x24a   :  { %v528_v24 = vpop.eup %527 }
 0x24b   :  { %v258_v25 = vmul.f32 %v528_v24, %v464_v23 }
 0x24d   :  { %v260_v27 = vmul.f32 %v258_v25, %v241_v16  ;;  %v259_v28 = vmul.f32 %v258_v25, %v229_v6 }
 0x24f   :  { %v267_v29 = vsub.f32 %v465_v26, %v260_v27 }
 0x251   :  { %v268_v30 = vadd.f32 %v267_v29, %v259_v28 }
 0x253   :  { %v269_v31 = vmax.f32 %v268_v30, 0.0 }
 0x255   :  { %v270_v32 = vpack.c.bf16 %v269_v31, %v269_v31 }
 0x257   :  { %495 = vmatmul.mubr.msk.bf16.vlgmr.msra.gmra.mrb[0].mxu1 %vm236_vm2, %v270_v32 }
 0x32a   :  { %v331_v34 = vpop.f32.mrb[0].mxu1 }
 0x32b   :  { %v332_v35 = vadd.f32 %v466_v33, %v331_v34  ;;  %v496_v36 = vpop.f32.mrb[1].mxu1 }
 0x32c   :  { %v334_v37 = vpop.f32.mrb[2].mxu1 }
 0x32d   :  { %v497_v38 = vpop.f32.mrb[3].mxu1  ;;  %v339_v39 = vsel %vm236_vm2, %v332_v35, 0.0  ;;  %v343_v40 = vmul.f32 %v332_v35, %v332_v35 }
 0x32e   :  { %340 = vadd.xlane.f32.xlu1 %v339_v39 }
 0x32f   :  { %v344_v41 = vsel %vm236_vm2, %v343_v40, 0.0 }
 0x332   :  { %345 = vadd.xlane.f32.xlu1 %v344_v41 }
 0x3bb   :  { %v341_v44 = vpop.xlane.xlu1 %340 }
 0x3bc   :  { %v342_v45 = vmul.f32 0.03125, %v341_v44 }
 0x3be   :  { %v348_v47 = vmul.f32 %v342_v45, %v342_v45 }
 0x3bf   :  { %v346_v46 = vpop.xlane.xlu1 %345 }
 0x3c0   :  { %v347_v48 = vmul.f32 0.03125, %v346_v46 }
 0x3c2   :  { %v349_v49 = vsub.f32 %v347_v48, %v348_v47 }
 0x3c4   :  { %v350_v50 = vmax.f32 %v349_v49, 0.0 }
 0x3c6   :  { %v351_v51 = vadd.f32 1e-05, %v350_v50 }
 0x3c8   :  { %529 = vrsqrt.f32 %v351_v51 }
 0x3d2   :  { %v530_v53 = vpop.eup %529 }
 0x3d3   :  { %v359_v54 = vmul.f32 %v530_v53, %v470_v52 }
 0x3d5   :  { %v361_v56 = vmul.f32 %v359_v54, %v342_v45  ;;  %v360_v57 = vmul.f32 %v359_v54, %v332_v35 }
 0x3d7   :  { %v368_v58 = vsub.f32 %v471_v55, %v361_v56 }
 0x3d9   :  { %v369_v59 = vadd.f32 %v368_v58, %v360_v57 }
 0x3db   :  { %v370_v60 = vmax.f32 %v369_v59, 0.0 }
 0x3dd   :  { %v371_v61 = vpack.c.bf16 %v370_v60, %v370_v60 }
 0x3df   :  { %503 = vmatmul.mubr.msk.bf16.vlgmr.msra.gmra.mrb[4].mxu0 %vm236_vm2, %v371_v61 }
 0x4b2   :  { %v432_v63 = vpop.f32.mrb[4].mxu0 }
 0x4b3   :  { %v433_v0 = vadd.f32 %v472_v62, %v432_v63  ;;  %v504_v1 = vpop.f32.mrb[5].mxu0 }
 0x4b4   :  { %v435_v2 = vpop.f32.mrb[6].mxu0 }
 0x4b5   :  { %531 = vtanh.f32 %v433_v0  ;;  %v505_v3 = vpop.f32.mrb[7].mxu0 }
 0x4bf   :  { %v532_v4 = vpop.eup %531 }
 0x4c0   :  { %440 = vst.msk [vmem:[#allocation20] sm:$0xff] %vm439_vm3, %v532_v4 }
 0x4c1   :  { %786 = shalt.err (!%p783_p8)
}
 0x4c2   :  { %s787_s18 = scalar_lea.hbm %s1065_s11, 128 }
 0x4c3   :  { %p788_p9 = scmp.ne.s32.totalorder %s1065_s11, %s787_s18  ;;  %p791_p10 = scmp.lt.u32.totalorder %s787_s18, %s1065_s11 }
 0x4c5   :  { %p793_p11 = pnand %p791_p10, %p788_p9 }
 0x4c7   :  { %796 = shalt.err (!%p793_p11)
}
 0x4c8   :  { %450 = dma.vmem_to_hbm [thread:$0]  %s448_s7, 128, %s1065_s11, [#allocation4]  }
 0x4c9   :  { %809 = dma.done.wait [#allocation4], 128  }
 0x4ca   :  { %810 = vsyncadd [#allocation4], 4294967168 }
 0x4cb   :  { %454 = vsyncpa [#allocation3], 1 }
 0x4cc   :  { %455 = vsyncpa [#allocation6], 1 }
 0x4cd   :  { %456 = vsyncpa [#allocation9], 1 }
 0x4ce   :  { %457 = vsyncpa [#allocation12], 1 }
 0x4cf   :  { %458 = vsyncpa [#allocation15], 1 }
 0x4d0   :  { %459 = vsyncpa [#allocation18], 1 }
 0x4d1   :  { %460 = vsyncpa [#allocation4], 1 }

</bundles_post_ra>
